<compile_context>
chip_gen: v7x
topology: tpu7x:2x2x1
jax: 0.10.0
libtpu: 0.0.40
codegen_flags: <defaults>
</compile_context>

<pallas_src>
import functools

import jax
import jax.numpy as jnp
from jax import lax
from jax.experimental import pallas as pl
from jax.experimental.pallas import tpu as pltpu


def _round_up(x, m):
    return ((x + m - 1) // m) * m


def _encoder_rnn_kernel(
    x_ref,       # (Tblk, Bb, E)   embedded tokens for this (batch block, time chunk)
    w_ih_ref,    # (E,  Hp)
    w_hh_ref,    # (Hp, Hp)
    b_ref,       # (1,  Hp)        b_ih + b_hh (zero-padded)
    w_lin_ref,   # (Hp, Hp)
    b_lin_ref,   # (1,  Hp)
    w_out_ref,   # (Hp, Hdp)
    b_out_ref,   # (1,  Hdp)
    out_ref,     # (Tblk, Bb, Hp)  RNN outputs for this chunk
    hid_ref,     # (Bb, Hdp)       final transformed hidden (written on last chunk)
    h_scratch,   # VMEM (Bb, Hp)        recurrent carry, persists across time chunks
    xw_scratch,  # VMEM (Tblk, Bb, Hp)  precomputed input projection for the chunk
    *,
    time_block,
    batch_block,
    seq_len,
    needs_time_mask,
    unroll,
):
    c = pl.program_id(1)   # time-chunk index (axis 0 is the parallel batch axis)

    @pl.when(c == 0)
    def _():
        h_scratch[...] = jnp.zeros_like(h_scratch)

    # ---- Phase 1 (off the serial critical path) ------------------------------
    # One large MXU matmul for the whole chunk: X @ W_ih + (b_ih + b_hh).
    emb_dim = x_ref.shape[-1]
    hp = w_ih_ref.shape[-1]
    x2 = x_ref[...].reshape(time_block * batch_block, emb_dim)
    xw = jnp.dot(x2, w_ih_ref[...], preferred_element_type=jnp.float32) + b_ref[...]
    xw_scratch[...] = xw.reshape(time_block, batch_block, hp)

    w_hh = w_hh_ref[...]          # hoist the weight load out of the loop
    t0 = c * time_block

    # ---- Phase 2: serial recurrence ------------------------------------------
    # Per step only: h_t = tanh(precomp[t] + h_{t-1} @ W_hh)
    def step(j, h):
        pre = xw_scratch[j] + jnp.dot(h, w_hh, preferred_element_type=jnp.float32)
        h_new = jnp.tanh(pre)
        out_ref[j] = h_new.astype(out_ref.dtype)   # lane-dense (Bb, 128k) store
        if needs_time_mask:
            # Padded timesteps (beyond the real seq_len) must not advance the carry.
            h_new = jnp.where(t0 + j < seq_len, h_new, h)
        return h_new

    h_final = lax.fori_loop(0, time_block, step, h_scratch[...], unroll=unroll)
    h_scratch[...] = h_final

    # ---- Final head on the last chunk only ------------------------------------
    @pl.when(c == pl.num_programs(1) - 1)
    def _():
        # hidden = tanh(Out(ReLU(Linear(h_last))))
        lin = (
            jnp.dot(h_final, w_lin_ref[...], preferred_element_type=jnp.float32)
            + b_lin_ref[...]
        )
        relu = jnp.maximum(lin, 0.0)
        out = (
            jnp.dot(relu, w_out_ref[...], preferred_element_type=jnp.float32)
            + b_out_ref[...]
        )
        hid_ref[...] = jnp.tanh(out).astype(hid_ref.dtype)


def encoder_forward(tokens, params, *, max_time_block=256):
    """tokens: int32 (B, S).  Returns (output (B, S, H), hidden (1, B, Hd))."""
    emb = params["embedding"]        # (V, E)
    w_ih = params["w_ih"]            # (E, H)   stored transposed (in, out)
    w_hh = params["w_hh"]            # (H, H)
    b = params["b"]                  # (1, H)   b_ih + b_hh
    w_lin = params["w_lin"]          # (H, H)
    b_lin = params["b_lin"]          # (1, H)
    w_out = params["w_out"]          # (H, Hd)
    b_out = params["b_out"]          # (1, Hd)

    B, S = tokens.shape
    E = emb.shape[1]
    H = w_hh.shape[0]
    Hd = w_out.shape[1]

    # ---- lane-dense padding of the hidden dims -------------------------------
    Hp = _round_up(H, 128)
    Hdp = _round_up(Hd, 128)

    # ---- batch padding + batch blocks (megacore split on v7x) ----------------
    Bp = _round_up(B, 8)
    if Bp <= 64:
        Bb, n_bb = Bp, 1
    else:
        Bb = _round_up(pl.cdiv(Bp, 2), 8)
        n_bb = 2
        Bp = n_bb * Bb

    # ---- VMEM-budgeted time chunk (safe on v5e 16MiB scoped / v7x 64MiB) -----
    # per-step bytes: 2x-buffered x block + 2x-buffered out block + xw_scratch.
    bytes_per_step = Bb * 4 * (2 * E + 3 * Hp)
    vmem_budget = 12 * 1024 * 1024
    cap = max(1, min(max_time_block, vmem_budget // max(1, bytes_per_step)))
    n_chunks = pl.cdiv(S, cap)
    time_block = pl.cdiv(S, n_chunks)
    Sp = n_chunks * time_block
    needs_time_mask = Sp != S
    unroll = time_block if time_block <= 16 else 8

    # ---- zero-pad weights to lane-dense shapes --------------------------------
    w_ih_p = jnp.pad(w_ih, ((0, 0), (0, Hp - H)))
    w_hh_p = jnp.pad(w_hh, ((0, Hp - H), (0, Hp - H)))
    b_p = jnp.pad(b, ((0, 0), (0, Hp - H)))
    w_lin_p = jnp.pad(w_lin, ((0, Hp - H), (0, Hp - H)))
    b_lin_p = jnp.pad(b_lin, ((0, 0), (0, Hp - H)))
    w_out_p = jnp.pad(w_out, ((0, Hp - H), (0, Hdp - Hd)))
    b_out_p = jnp.pad(b_out, ((0, 0), (0, Hdp - Hd)))

    # Embedding lookup kept in plain JAX glue, gathered directly in time-major
    # order so no big transpose of the embedded sequence is needed on input.
    # Padded batch rows / timesteps reuse token id 0 and are sliced off below.
    tok_p = jnp.pad(tokens, ((0, Bp - B), (0, Sp - S)))
    x_tm = jnp.take(emb, tok_p.T, axis=0)            # (Sp, Bp, E)
    # TODO(synk): embedding gather is not fused into the kernel (stays as one
    # XLA gather); Dropout is identity here (eval mode) — no training RNG mask.

    kernel = functools.partial(
        _encoder_rnn_kernel,
        time_block=time_block,
        batch_block=Bb,
        seq_len=S,
        needs_time_mask=needs_time_mask,
        unroll=unroll,
    )

    wmap = lambda bb, c: (0, 0)

    out_tm, hidden = pl.pallas_call(
        kernel,
        out_shape=(
            jax.ShapeDtypeStruct((Sp, Bp, Hp), jnp.float32),
            jax.ShapeDtypeStruct((Bp, Hdp), jnp.float32),
        ),
        grid_spec=pltpu.PrefetchScalarGridSpec(
            num_scalar_prefetch=0,
            grid=(n_bb, n_chunks),
            in_specs=[
                pl.BlockSpec((time_block, Bb, E), lambda bb, c: (c, bb, 0)),
                pl.BlockSpec((E, Hp), wmap),
                pl.BlockSpec((Hp, Hp), wmap),
                pl.BlockSpec((1, Hp), wmap),
                pl.BlockSpec((Hp, Hp), wmap),
                pl.BlockSpec((1, Hp), wmap),
                pl.BlockSpec((Hp, Hdp), wmap),
                pl.BlockSpec((1, Hdp), wmap),
            ],
            out_specs=[
                pl.BlockSpec((time_block, Bb, Hp), lambda bb, c: (c, bb, 0)),
                pl.BlockSpec((Bb, Hdp), lambda bb, c: (bb, 0)),
            ],
            scratch_shapes=[
                pltpu.VMEM((Bb, Hp), jnp.float32),              # recurrent carry
                pltpu.VMEM((time_block, Bb, Hp), jnp.float32),  # input projection
            ],
        ),
        compiler_params=pltpu.CompilerParams(
            # batch blocks are independent -> parallel (v7x megacore);
            # time chunks carry the recurrent state -> arbitrary/serial.
            dimension_semantics=("parallel", "arbitrary"),
        ),
    )(x_tm, w_ih_p, w_hh_p, b_p, w_lin_p, b_lin_p, w_out_p, b_out_p)

    output = jnp.transpose(out_tm, (1, 0, 2))[:B, :S, :H]   # (B, S, H) batch_first
    hidden = hidden[None, :B, :Hd]                          # (1, B, Hd)
    return output, hidden


def init_params(key, input_size, emb_size, enc_hidden, dec_hidden):
    ks = jax.random.split(key, 8)
    scale = 0.1
    params = {
        "embedding": scale * jax.random.normal(ks[0], (input_size, emb_size), jnp.float32),
        # RNN weights (stored transposed: (in, out))
        "w_ih": scale * jax.random.normal(ks[1], (emb_size, enc_hidden), jnp.float32),
        "w_hh": scale * jax.random.normal(ks[2], (enc_hidden, enc_hidden), jnp.float32),
        "b": scale * jax.random.normal(ks[3], (1, enc_hidden), jnp.float32),
        # head: linear -> relu -> out -> tanh
        "w_lin": scale * jax.random.normal(ks[4], (enc_hidden, enc_hidden), jnp.float32),
        "b_lin": scale * jax.random.normal(ks[5], (1, enc_hidden), jnp.float32),
        "w_out": scale * jax.random.normal(ks[6], (enc_hidden, dec_hidden), jnp.float32),
        "b_out": scale * jax.random.normal(ks[7], (1, dec_hidden), jnp.float32),
    }
    return params


def reference_forward(tokens, params):
    """Pure-JAX reference for the correctness check."""
    x = jnp.take(params["embedding"], tokens, axis=0)   # (B, S, E)
    B, S, E = x.shape
    H = params["w_hh"].shape[0]
    h = jnp.zeros((B, H), jnp.float32)
    outs = []
    for t in range(S):
        h = jnp.tanh(x[:, t, :] @ params["w_ih"] + h @ params["w_hh"] + params["b"])
        outs.append(h)
    output = jnp.stack(outs, axis=1)                     # (B, S, H)
    lin = h @ params["w_lin"] + params["b_lin"]
    relu = jnp.maximum(lin, 0.0)
    hidden = jnp.tanh(relu @ params["w_out"] + params["b_out"])[None]
    return output, hidden


if __name__ == "__main__":
    # Small shapes consistent with the module's forward: input (batch, seq) of token ids.
    input_size = 50      # vocab
    emb_size = 32
    encoder_hidden_size = 32
    decoder_hidden_size = 32
    batch, seq = 4, 8

    key = jax.random.PRNGKey(0)
    k_tok, k_par = jax.random.split(key)
    tokens = jax.random.randint(k_tok, (batch, seq), 0, input_size, dtype=jnp.int32)
    params = init_params(k_par, input_size, emb_size, encoder_hidden_size, decoder_hidden_size)

    fwd = jax.jit(encoder_forward)
    output, hidden = fwd(tokens, params)
    jax.block_until_ready((output, hidden))

    ref_out, ref_hid = reference_forward(tokens, params)
    assert output.shape == (batch, seq, encoder_hidden_size)
    assert hidden.shape == (1, batch, decoder_hidden_size)
    # Tolerance absorbs MXU f32-pass vs XLA matmul precision differences; a real
    # semantics/layout bug produces errors orders of magnitude above this.
    assert jnp.allclose(output, ref_out, atol=2e-3, rtol=2e-3), float(
        jnp.max(jnp.abs(output - ref_out))
    )
    assert jnp.allclose(hidden, ref_hid, atol=2e-3, rtol=2e-3), float(
        jnp.max(jnp.abs(hidden - ref_hid))
    )

    print("KERNEL_OK")
</pallas_src>

<mosaic_0001>
module attributes {stable_mosaic.version = 11 : i64} {
  func.func @_encoder_rnn_kernel(%arg0: i32, %arg1: i32, %arg2: memref<8x8x32xf32, #tpu.memory_space<vmem>>, %arg3: memref<32x128xf32, #tpu.memory_space<vmem>>, %arg4: memref<128x128xf32, #tpu.memory_space<vmem>>, %arg5: memref<1x128xf32, #tpu.memory_space<vmem>>, %arg6: memref<128x128xf32, #tpu.memory_space<vmem>>, %arg7: memref<1x128xf32, #tpu.memory_space<vmem>>, %arg8: memref<128x128xf32, #tpu.memory_space<vmem>>, %arg9: memref<1x128xf32, #tpu.memory_space<vmem>>, %arg10: memref<8x8x128xf32, #tpu.memory_space<vmem>>, %arg11: memref<8x128xf32, #tpu.memory_space<vmem>>, %arg12: memref<8x128xf32, #tpu.memory_space<vmem>>, %arg13: memref<8x8x128xf32, #tpu.memory_space<vmem>>) attributes {dimension_semantics = [#tpu.dimension_semantics<parallel>, #tpu.dimension_semantics<arbitrary>], iteration_bounds = array<i64: 1, 1>, scalar_prefetch = 0 : i64, scratch_operands = 2 : i64, tpu.core_type = #tpu.core_type<tc>, window_params = [{transform_indices = @transform_0, window_bounds = array<i64: 8, 8, 32>}, {pipeline_mode = #tpu.pipeline_mode<synchronous>, transform_indices = @transform_1, window_bounds = array<i64: 32, 128>}, {pipeline_mode = #tpu.pipeline_mode<synchronous>, transform_indices = @transform_2, window_bounds = array<i64: 128, 128>}, {pipeline_mode = #tpu.pipeline_mode<synchronous>, transform_indices = @transform_3, window_bounds = array<i64: 1, 128>}, {pipeline_mode = #tpu.pipeline_mode<synchronous>, transform_indices = @transform_4, window_bounds = array<i64: 128, 128>}, {pipeline_mode = #tpu.pipeline_mode<synchronous>, transform_indices = @transform_5, window_bounds = array<i64: 1, 128>}, {pipeline_mode = #tpu.pipeline_mode<synchronous>, transform_indices = @transform_6, window_bounds = array<i64: 128, 128>}, {pipeline_mode = #tpu.pipeline_mode<synchronous>, transform_indices = @transform_7, window_bounds = array<i64: 1, 128>}, {transform_indices = @transform_8, window_bounds = array<i64: 8, 8, 128>}, {transform_indices = @transform_9, window_bounds = array<i64: 8, 128>}]} {
    %c0_i32 = arith.constant 0 : i32
    %0 = arith.cmpi eq, %arg1, %c0_i32 : i32
    %1 = arith.extui %0 : i1 to i32
    %c0_i32_0 = arith.constant 0 : i32
    %2 = arith.cmpi ne, %1, %c0_i32_0 : i32
    scf.if %2 {
      %cst_59 = arith.constant 0.000000e+00 : f32
      %98 = vector.broadcast %cst_59 : f32 to vector<8x128xf32>
      %c0_60 = arith.constant 0 : index
      %c0_61 = arith.constant 0 : index
      %99 = vector.load %arg12[%c0_60, %c0_61] : memref<8x128xf32, #tpu.memory_space<vmem>>, vector<8x128xf32>
      tpu.vector_store %arg12[%c0_60, %c0_61], %98 {strides = array<i32>} : memref<8x128xf32, #tpu.memory_space<vmem>>, vector<8x128xf32>,
    } else {
    }
    %c0 = arith.constant 0 : index
    %c0_1 = arith.constant 0 : index
    %c0_2 = arith.constant 0 : index
    %3 = vector.load %arg2[%c0, %c0_1, %c0_2] : memref<8x8x32xf32, #tpu.memory_space<vmem>>, vector<8x8x32xf32>
    %4 = vector.shape_cast %3 : vector<8x8x32xf32> to vector<64x32xf32>
    %c0_3 = arith.constant 0 : index
    %c0_4 = arith.constant 0 : index
    %5 = vector.load %arg3[%c0_3, %c0_4] : memref<32x128xf32, #tpu.memory_space<vmem>>, vector<32x128xf32>
    %cst = arith.constant dense<0.000000e+00> : vector<64x128xf32>
    %6 = tpu.matmul %4, %5, %cst {dimension_numbers = #tpu.dot_dimension_numbers<[1], [0], [0], [1], [0, 0, 1, 1], [], []>} : vector<64x32xf32>, vector<32x128xf32>, vector<64x128xf32> -> vector<64x128xf32>
    %c0_5 = arith.constant 0 : index
    %c0_6 = arith.constant 0 : index
    %7 = vector.load %arg5[%c0_5, %c0_6] : memref<1x128xf32, #tpu.memory_space<vmem>>, vector<1x128xf32>
    %8 = vector.broadcast %7 : vector<1x128xf32> to vector<64x128xf32>
    %9 = arith.addf %6, %8 : vector<64x128xf32>
    %10 = vector.shape_cast %9 : vector<64x128xf32> to vector<8x8x128xf32>
    %c0_7 = arith.constant 0 : index
    %c0_8 = arith.constant 0 : index
    %c0_9 = arith.constant 0 : index
    %11 = vector.load %arg13[%c0_7, %c0_8, %c0_9] : memref<8x8x128xf32, #tpu.memory_space<vmem>>, vector<8x8x128xf32>
    tpu.vector_store %arg13[%c0_7, %c0_8, %c0_9], %10 {strides = array<i32>} : memref<8x8x128xf32, #tpu.memory_space<vmem>>, vector<8x8x128xf32>,
    %c0_10 = arith.constant 0 : index
    %c0_11 = arith.constant 0 : index
    %12 = vector.load %arg4[%c0_10, %c0_11] : memref<128x128xf32, #tpu.memory_space<vmem>>, vector<128x128xf32>
    %c0_12 = arith.constant 0 : index
    %c0_13 = arith.constant 0 : index
    %13 = vector.load %arg12[%c0_12, %c0_13] : memref<8x128xf32, #tpu.memory_space<vmem>>, vector<8x128xf32>
    %c0_i32_14 = arith.constant 0 : i32
    %14 = arith.index_cast %c0_i32_14 : i32 to index
    %c0_15 = arith.constant 0 : index
    %c0_16 = arith.constant 0 : index
    %15 = vector.load %arg13[%14, %c0_15, %c0_16] : memref<8x8x128xf32, #tpu.memory_space<vmem>>, vector<1x8x128xf32>
    %16 = vector.shape_cast %15 : vector<1x8x128xf32> to vector<8x128xf32>
    %cst_17 = arith.constant dense<0.000000e+00> : vector<8x128xf32>
    %17 = tpu.matmul %13, %12, %cst_17 {dimension_numbers = #tpu.dot_dimension_numbers<[1], [0], [0], [1], [0, 0, 1, 1], [], []>} : vector<8x128xf32>, vector<128x128xf32>, vector<8x128xf32> -> vector<8x128xf32>
    %18 = arith.addf %16, %17 : vector<8x128xf32>
    %19 = math.tanh %18 : vector<8x128xf32>
    %20 = arith.index_cast %c0_i32_14 : i32 to index
    %c0_18 = arith.constant 0 : index
    %c0_19 = arith.constant 0 : index
    %21 = vector.load %arg10[%20, %c0_18, %c0_19] : memref<8x8x128xf32, #tpu.memory_space<vmem>>, vector<1x8x128xf32>
    %22 = vector.shape_cast %21 : vector<1x8x128xf32> to vector<8x128xf32>
    %23 = vector.shape_cast %19 : vector<8x128xf32> to vector<1x8x128xf32>
    tpu.vector_store %arg10[%20, %c0_18, %c0_19], %23 {strides = array<i32>} : memref<8x8x128xf32, #tpu.memory_space<vmem>>, vector<1x8x128xf32>,
    %c1_i32 = arith.constant 1 : i32
    %24 = arith.index_cast %c1_i32 : i32 to index
    %c0_20 = arith.constant 0 : index
    %c0_21 = arith.constant 0 : index
    %25 = vector.load %arg13[%24, %c0_20, %c0_21] : memref<8x8x128xf32, #tpu.memory_space<vmem>>, vector<1x8x128xf32>
    %26 = vector.shape_cast %25 : vector<1x8x128xf32> to vector<8x128xf32>
    %cst_22 = arith.constant dense<0.000000e+00> : vector<8x128xf32>
    %27 = tpu.matmul %19, %12, %cst_22 {dimension_numbers = #tpu.dot_dimension_numbers<[1], [0], [0], [1], [0, 0, 1, 1], [], []>} : vector<8x128xf32>, vector<128x128xf32>, vector<8x128xf32> -> vector<8x128xf32>
    %28 = arith.addf %26, %27 : vector<8x128xf32>
    %29 = math.tanh %28 : vector<8x128xf32>
    %30 = arith.index_cast %c1_i32 : i32 to index
    %c0_23 = arith.constant 0 : index
    %c0_24 = arith.constant 0 : index
    %31 = vector.load %arg10[%30, %c0_23, %c0_24] : memref<8x8x128xf32, #tpu.memory_space<vmem>>, vector<1x8x128xf32>
    %32 = vector.shape_cast %31 : vector<1x8x128xf32> to vector<8x128xf32>
    %33 = vector.shape_cast %29 : vector<8x128xf32> to vector<1x8x128xf32>
    tpu.vector_store %arg10[%30, %c0_23, %c0_24], %33 {strides = array<i32>} : memref<8x8x128xf32, #tpu.memory_space<vmem>>, vector<1x8x128xf32>,
    %c2_i32 = arith.constant 2 : i32
    %34 = arith.index_cast %c2_i32 : i32 to index
    %c0_25 = arith.constant 0 : index
    %c0_26 = arith.constant 0 : index
    %35 = vector.load %arg13[%34, %c0_25, %c0_26] : memref<8x8x128xf32, #tpu.memory_space<vmem>>, vector<1x8x128xf32>
    %36 = vector.shape_cast %35 : vector<1x8x128xf32> to vector<8x128xf32>
    %cst_27 = arith.constant dense<0.000000e+00> : vector<8x128xf32>
    %37 = tpu.matmul %29, %12, %cst_27 {dimension_numbers = #tpu.dot_dimension_numbers<[1], [0], [0], [1], [0, 0, 1, 1], [], []>} : vector<8x128xf32>, vector<128x128xf32>, vector<8x128xf32> -> vector<8x128xf32>
    %38 = arith.addf %36, %37 : vector<8x128xf32>
    %39 = math.tanh %38 : vector<8x128xf32>
    %40 = arith.index_cast %c2_i32 : i32 to index
    %c0_28 = arith.constant 0 : index
    %c0_29 = arith.constant 0 : index
    %41 = vector.load %arg10[%40, %c0_28, %c0_29] : memref<8x8x128xf32, #tpu.memory_space<vmem>>, vector<1x8x128xf32>
    %42 = vector.shape_cast %41 : vector<1x8x128xf32> to vector<8x128xf32>
    %43 = vector.shape_cast %39 : vector<8x128xf32> to vector<1x8x128xf32>
    tpu.vector_store %arg10[%40, %c0_28, %c0_29], %43 {strides = array<i32>} : memref<8x8x128xf32, #tpu.memory_space<vmem>>, vector<1x8x128xf32>,
    %c3_i32 = arith.constant 3 : i32
    %44 = arith.index_cast %c3_i32 : i32 to index
    %c0_30 = arith.constant 0 : index
    %c0_31 = arith.constant 0 : index
    %45 = vector.load %arg13[%44, %c0_30, %c0_31] : memref<8x8x128xf32, #tpu.memory_space<vmem>>, vector<1x8x128xf32>
    %46 = vector.shape_cast %45 : vector<1x8x128xf32> to vector<8x128xf32>
    %cst_32 = arith.constant dense<0.000000e+00> : vector<8x128xf32>
    %47 = tpu.matmul %39, %12, %cst_32 {dimension_numbers = #tpu.dot_dimension_numbers<[1], [0], [0], [1], [0, 0, 1, 1], [], []>} : vector<8x128xf32>, vector<128x128xf32>, vector<8x128xf32> -> vector<8x128xf32>
    %48 = arith.addf %46, %47 : vector<8x128xf32>
    %49 = math.tanh %48 : vector<8x128xf32>
    %50 = arith.index_cast %c3_i32 : i32 to index
    %c0_33 = arith.constant 0 : index
    %c0_34 = arith.constant 0 : index
    %51 = vector.load %arg10[%50, %c0_33, %c0_34] : memref<8x8x128xf32, #tpu.memory_space<vmem>>, vector<1x8x128xf32>
    %52 = vector.shape_cast %51 : vector<1x8x128xf32> to vector<8x128xf32>
    %53 = vector.shape_cast %49 : vector<8x128xf32> to vector<1x8x128xf32>
    tpu.vector_store %arg10[%50, %c0_33, %c0_34], %53 {strides = array<i32>} : memref<8x8x128xf32, #tpu.memory_space<vmem>>, vector<1x8x128xf32>,
    %c4_i32 = arith.constant 4 : i32
    %54 = arith.index_cast %c4_i32 : i32 to index
    %c0_35 = arith.constant 0 : index
    %c0_36 = arith.constant 0 : index
    %55 = vector.load %arg13[%54, %c0_35, %c0_36] : memref<8x8x128xf32, #tpu.memory_space<vmem>>, vector<1x8x128xf32>
    %56 = vector.shape_cast %55 : vector<1x8x128xf32> to vector<8x128xf32>
    %cst_37 = arith.constant dense<0.000000e+00> : vector<8x128xf32>
    %57 = tpu.matmul %49, %12, %cst_37 {dimension_numbers = #tpu.dot_dimension_numbers<[1], [0], [0], [1], [0, 0, 1, 1], [], []>} : vector<8x128xf32>, vector<128x128xf32>, vector<8x128xf32> -> vector<8x128xf32>
    %58 = arith.addf %56, %57 : vector<8x128xf32>
    %59 = math.tanh %58 : vector<8x128xf32>
    %60 = arith.index_cast %c4_i32 : i32 to index
    %c0_38 = arith.constant 0 : index
    %c0_39 = arith.constant 0 : index
    %61 = vector.load %arg10[%60, %c0_38, %c0_39] : memref<8x8x128xf32, #tpu.memory_space<vmem>>, vector<1x8x128xf32>
    %62 = vector.shape_cast %61 : vector<1x8x128xf32> to vector<8x128xf32>
    %63 = vector.shape_cast %59 : vector<8x128xf32> to vector<1x8x128xf32>
    tpu.vector_store %arg10[%60, %c0_38, %c0_39], %63 {strides = array<i32>} : memref<8x8x128xf32, #tpu.memory_space<vmem>>, vector<1x8x128xf32>,
    %c5_i32 = arith.constant 5 : i32
    %64 = arith.index_cast %c5_i32 : i32 to index
    %c0_40 = arith.constant 0 : index
    %c0_41 = arith.constant 0 : index
    %65 = vector.load %arg13[%64, %c0_40, %c0_41] : memref<8x8x128xf32, #tpu.memory_space<vmem>>, vector<1x8x128xf32>
    %66 = vector.shape_cast %65 : vector<1x8x128xf32> to vector<8x128xf32>
    %cst_42 = arith.constant dense<0.000000e+00> : vector<8x128xf32>
    %67 = tpu.matmul %59, %12, %cst_42 {dimension_numbers = #tpu.dot_dimension_numbers<[1], [0], [0], [1], [0, 0, 1, 1], [], []>} : vector<8x128xf32>, vector<128x128xf32>, vector<8x128xf32> -> vector<8x128xf32>
    %68 = arith.addf %66, %67 : vector<8x128xf32>
    %69 = math.tanh %68 : vector<8x128xf32>
    %70 = arith.index_cast %c5_i32 : i32 to index
    %c0_43 = arith.constant 0 : index
    %c0_44 = arith.constant 0 : index
    %71 = vector.load %arg10[%70, %c0_43, %c0_44] : memref<8x8x128xf32, #tpu.memory_space<vmem>>, vector<1x8x128xf32>
    %72 = vector.shape_cast %71 : vector<1x8x128xf32> to vector<8x128xf32>
    %73 = vector.shape_cast %69 : vector<8x128xf32> to vector<1x8x128xf32>
    tpu.vector_store %arg10[%70, %c0_43, %c0_44], %73 {strides = array<i32>} : memref<8x8x128xf32, #tpu.memory_space<vmem>>, vector<1x8x128xf32>,
    %c6_i32 = arith.constant 6 : i32
    %74 = arith.index_cast %c6_i32 : i32 to index
    %c0_45 = arith.constant 0 : index
    %c0_46 = arith.constant 0 : index
    %75 = vector.load %arg13[%74, %c0_45, %c0_46] : memref<8x8x128xf32, #tpu.memory_space<vmem>>, vector<1x8x128xf32>
    %76 = vector.shape_cast %75 : vector<1x8x128xf32> to vector<8x128xf32>
    %cst_47 = arith.constant dense<0.000000e+00> : vector<8x128xf32>
    %77 = tpu.matmul %69, %12, %cst_47 {dimension_numbers = #tpu.dot_dimension_numbers<[1], [0], [0], [1], [0, 0, 1, 1], [], []>} : vector<8x128xf32>, vector<128x128xf32>, vector<8x128xf32> -> vector<8x128xf32>
    %78 = arith.addf %76, %77 : vector<8x128xf32>
    %79 = math.tanh %78 : vector<8x128xf32>
    %80 = arith.index_cast %c6_i32 : i32 to index
    %c0_48 = arith.constant 0 : index
    %c0_49 = arith.constant 0 : index
    %81 = vector.load %arg10[%80, %c0_48, %c0_49] : memref<8x8x128xf32, #tpu.memory_space<vmem>>, vector<1x8x128xf32>
    %82 = vector.shape_cast %81 : vector<1x8x128xf32> to vector<8x128xf32>
    %83 = vector.shape_cast %79 : vector<8x128xf32> to vector<1x8x128xf32>
    tpu.vector_store %arg10[%80, %c0_48, %c0_49], %83 {strides = array<i32>} : memref<8x8x128xf32, #tpu.memory_space<vmem>>, vector<1x8x128xf32>,
    %c7_i32 = arith.constant 7 : i32
    %84 = arith.index_cast %c7_i32 : i32 to index
    %c0_50 = arith.constant 0 : index
    %c0_51 = arith.constant 0 : index
    %85 = vector.load %arg13[%84, %c0_50, %c0_51] : memref<8x8x128xf32, #tpu.memory_space<vmem>>, vector<1x8x128xf32>
    %86 = vector.shape_cast %85 : vector<1x8x128xf32> to vector<8x128xf32>
    %cst_52 = arith.constant dense<0.000000e+00> : vector<8x128xf32>
    %87 = tpu.matmul %79, %12, %cst_52 {dimension_numbers = #tpu.dot_dimension_numbers<[1], [0], [0], [1], [0, 0, 1, 1], [], []>} : vector<8x128xf32>, vector<128x128xf32>, vector<8x128xf32> -> vector<8x128xf32>
    %88 = arith.addf %86, %87 : vector<8x128xf32>
    %89 = math.tanh %88 : vector<8x128xf32>
    %90 = arith.index_cast %c7_i32 : i32 to index
    %c0_53 = arith.constant 0 : index
    %c0_54 = arith.constant 0 : index
    %91 = vector.load %arg10[%90, %c0_53, %c0_54] : memref<8x8x128xf32, #tpu.memory_space<vmem>>, vector<1x8x128xf32>
    %92 = vector.shape_cast %91 : vector<1x8x128xf32> to vector<8x128xf32>
    %93 = vector.shape_cast %89 : vector<8x128xf32> to vector<1x8x128xf32>
    tpu.vector_store %arg10[%90, %c0_53, %c0_54], %93 {strides = array<i32>} : memref<8x8x128xf32, #tpu.memory_space<vmem>>, vector<1x8x128xf32>,
    %c8_i32 = arith.constant 8 : i32
    %c0_55 = arith.constant 0 : index
    %c0_56 = arith.constant 0 : index
    %94 = vector.load %arg12[%c0_55, %c0_56] : memref<8x128xf32, #tpu.memory_space<vmem>>, vector<8x128xf32>
    tpu.vector_store %arg12[%c0_55, %c0_56], %89 {strides = array<i32>} : memref<8x128xf32, #tpu.memory_space<vmem>>, vector<8x128xf32>,
    %c0_i32_57 = arith.constant 0 : i32
    %95 = arith.cmpi eq, %arg1, %c0_i32_57 : i32
    %96 = arith.extui %95 : i1 to i32
    %c0_i32_58 = arith.constant 0 : i32
    %97 = arith.cmpi ne, %96, %c0_i32_58 : i32
    scf.if %97 {
      %c0_59 = arith.constant 0 : index
      %c0_60 = arith.constant 0 : index
      %98 = vector.load %arg6[%c0_59, %c0_60] : memref<128x128xf32, #tpu.memory_space<vmem>>, vector<128x128xf32>
      %cst_61 = arith.constant dense<0.000000e+00> : vector<8x128xf32>
      %99 = tpu.matmul %89, %98, %cst_61 {dimension_numbers = #tpu.dot_dimension_numbers<[1], [0], [0], [1], [0, 0, 1, 1], [], []>} : vector<8x128xf32>, vector<128x128xf32>, vector<8x128xf32> -> vector<8x128xf32>
      %c0_62 = arith.constant 0 : index
      %c0_63 = arith.constant 0 : index
      %100 = vector.load %arg7[%c0_62, %c0_63] : memref<1x128xf32, #tpu.memory_space<vmem>>, vector<1x128xf32>
      %101 = vector.broadcast %100 : vector<1x128xf32> to vector<8x128xf32>
      %102 = arith.addf %99, %101 : vector<8x128xf32>
      %cst_64 = arith.constant 0.000000e+00 : f32
      %103 = vector.broadcast %cst_64 : f32 to vector<8x128xf32>
      %104 = arith.maximumf %102, %103 : vector<8x128xf32>
      %c0_65 = arith.constant 0 : index
      %c0_66 = arith.constant 0 : index
      %105 = vector.load %arg8[%c0_65, %c0_66] : memref<128x128xf32, #tpu.memory_space<vmem>>, vector<128x128xf32>
      %cst_67 = arith.constant dense<0.000000e+00> : vector<8x128xf32>
      %106 = tpu.matmul %104, %105, %cst_67 {dimension_numbers = #tpu.dot_dimension_numbers<[1], [0], [0], [1], [0, 0, 1, 1], [], []>} : vector<8x128xf32>, vector<128x128xf32>, vector<8x128xf32> -> vector<8x128xf32>
      %c0_68 = arith.constant 0 : index
      %c0_69 = arith.constant 0 : index
      %107 = vector.load %arg9[%c0_68, %c0_69] : memref<1x128xf32, #tpu.memory_space<vmem>>, vector<1x128xf32>
      %108 = vector.broadcast %107 : vector<1x128xf32> to vector<8x128xf32>
      %109 = arith.addf %106, %108 : vector<8x128xf32>
      %110 = math.tanh %109 : vector<8x128xf32>
      %c0_70 = arith.constant 0 : index
      %c0_71 = arith.constant 0 : index
      %111 = vector.load %arg11[%c0_70, %c0_71] : memref<8x128xf32, #tpu.memory_space<vmem>>, vector<8x128xf32>
      tpu.vector_store %arg11[%c0_70, %c0_71], %110 {strides = array<i32>} : memref<8x128xf32, #tpu.memory_space<vmem>>, vector<8x128xf32>,
    } else {
    }
    return
  }
  func.func @transform_0(%arg0: i32, %arg1: i32) -> (i32, i32, i32) {
    %c0_i32 = arith.constant 0 : i32
    %c0_i32_0 = arith.constant 0 : i32
    return %arg1, %arg0, %c0_i32 : i32, i32, i32
  }
  func.func @transform_1(%arg0: i32, %arg1: i32) -> (i32, i32) {
    %c0_i32 = arith.constant 0 : i32
    %c0_i32_0 = arith.constant 0 : i32
    %c0_i32_1 = arith.constant 0 : i32
    return %c0_i32, %c0_i32_0 : i32, i32
  }
  func.func @transform_2(%arg0: i32, %arg1: i32) -> (i32, i32) {
    %c0_i32 = arith.constant 0 : i32
    %c0_i32_0 = arith.constant 0 : i32
    %c0_i32_1 = arith.constant 0 : i32
    return %c0_i32, %c0_i32_0 : i32, i32
  }
  func.func @transform_3(%arg0: i32, %arg1: i32) -> (i32, i32) {
    %c0_i32 = arith.constant 0 : i32
    %c0_i32_0 = arith.constant 0 : i32
    %c0_i32_1 = arith.constant 0 : i32
    return %c0_i32, %c0_i32_0 : i32, i32
  }
  func.func @transform_4(%arg0: i32, %arg1: i32) -> (i32, i32) {
    %c0_i32 = arith.constant 0 : i32
    %c0_i32_0 = arith.constant 0 : i32
    %c0_i32_1 = arith.constant 0 : i32
    return %c0_i32, %c0_i32_0 : i32, i32
  }
  func.func @transform_5(%arg0: i32, %arg1: i32) -> (i32, i32) {
    %c0_i32 = arith.constant 0 : i32
    %c0_i32_0 = arith.constant 0 : i32
    %c0_i32_1 = arith.constant 0 : i32
    return %c0_i32, %c0_i32_0 : i32, i32
  }
  func.func @transform_6(%arg0: i32, %arg1: i32) -> (i32, i32) {
    %c0_i32 = arith.constant 0 : i32
    %c0_i32_0 = arith.constant 0 : i32
    %c0_i32_1 = arith.constant 0 : i32
    return %c0_i32, %c0_i32_0 : i32, i32
  }
  func.func @transform_7(%arg0: i32, %arg1: i32) -> (i32, i32) {
    %c0_i32 = arith.constant 0 : i32
    %c0_i32_0 = arith.constant 0 : i32
    %c0_i32_1 = arith.constant 0 : i32
    return %c0_i32, %c0_i32_0 : i32, i32
  }
  func.func @transform_8(%arg0: i32, %arg1: i32) -> (i32, i32, i32) {
    %c0_i32 = arith.constant 0 : i32
    %c0_i32_0 = arith.constant 0 : i32
    return %arg1, %arg0, %c0_i32 : i32, i32, i32
  }
  func.func @transform_9(%arg0: i32, %arg1: i32) -> (i32, i32) {
    %c0_i32 = arith.constant 0 : i32
    %c0_i32_0 = arith.constant 0 : i32
    return %arg0, %c0_i32 : i32, i32
  }
}

</mosaic_0001>

<bundles_post_ra>
// kernel: encoder_forward.1
= control target key start
LH: loop header
LB: loop body
LE: loop exit
PB: predicated region body
PF: predicated region fallthrough
CT: control target
= control target key end

     0   :  { %v1856_v0 = vmov 0.0|0.0   ;;  %vm1857_vm0 = vmmov 0   ;;  %v1858_v4 = vmov 0.0   ;;  %vm55_vm1 = vcmask 261120   ;;  %s2336_s2 = inlined_call_operand.vmem [shape: f32[128,128], index: 2, kind: input, shape index: {}]   ;;  %s2337_s1 = inlined_call_operand.vmem [shape: f32[32,128], index: 1, kind: input, shape index: {}]   ;;  %s2338_s0 = inlined_call_operand.vmem [shape: f32[8,8,32], index: 0, kind: input, shape index: {}]   ;;  %s2339_s3 = inlined_call_operand.vmem [shape: f32[1,128], index: 3, kind: input, shape index: {}]   ;;  %s2340_s8 = inlined_call_operand.vmem [shape: f32[8,8,128], index: 8, kind: output, shape index: {0}]   ;;  %s2341_s4 = inlined_call_operand.vmem [shape: f32[128,128], index: 4, kind: input, shape index: {}]   ;;  %s2342_s6 = inlined_call_operand.vmem [shape: f32[128,128], index: 6, kind: input, shape index: {}]   ;;  %s2343_s5 = inlined_call_operand.vmem [shape: f32[1,128], index: 5, kind: input, shape index: {}]   ;;  %s2344_s7 = inlined_call_operand.vmem [shape: f32[1,128], index: 7, kind: input, shape index: {}]   ;;  %s2345_s9 = inlined_call_operand.vmem [shape: f32[8,128], index: 9, kind: output, shape index: {1}]  }
   0x1   :  { %1595 = vmatprep.subr.bf16.mxu1 %v1856_v0  ;;  %v193_v1 = vld [vmem:[%s2336_s2] sm:$0xff]  ;;  %v194_v2 = vld [vmem:[%s2336_s2 + $0x8] sm:$0xff]  ;;  %v195_v3 = vld [vmem:[%s2336_s2 + $0x10] sm:$0xff]  ;;  %1269 = vmatprep.mubr.msk.f32.mxu1 %vm1857_vm0, %v1858_v4 }
   0x2   :  { %v1921_v5 = vpack.c.bf16 %v194_v2, %v193_v1  ;;  %v196_v6 = vld [vmem:[%s2336_s2 + $0x18] sm:$0xff]  ;;  %v44_v8 = vld [vmem:[%s2337_s1] sm:$0xff]  ;;  %v45_v9 = vld [vmem:[%s2337_s1 + $0x8] sm:$0xff] }
   0x3   :  { %v1927_v7 = vpack.c.bf16 %v196_v6, %v195_v3  ;;  %v197_v10 = vld [vmem:[%s2336_s2 + $0x20] sm:$0xff]  ;;  %v198_v11 = vld [vmem:[%s2336_s2 + $0x28] sm:$0xff]  ;;  %v1587_v12 = vpack.c.bf16 %v45_v9, %v44_v8  ;;  %v46_v13 = vld [vmem:[%s2337_s1 + $0x10] sm:$0xff] }
   0x4   :  { %1597 = vmatpush3.bf16.msra.mxu1 %v1921_v5  ;;  %v47_v14 = vld [vmem:[%s2337_s1 + $0x18] sm:$0xff]  ;;  %v36_v16 = vld [vmem:[%s2338_s0] sm:$0xff]  ;;  %v1952_v17 = vpack.c.bf16 %v198_v11, %v197_v10  ;;  %v199_v18 = vld [vmem:[%s2336_s2 + $0x30] sm:$0xff] }
   0x5   :  { %1598 = vmatprep.subr.bf16.mxu1 %v1856_v0  ;;  %1588 = vmatprep.subr.bf16.mxu0 %v1587_v12  ;;  %v1591_v15 = vpack.c.bf16 %v47_v14, %v46_v13  ;;  %v200_v19 = vld [vmem:[%s2336_s2 + $0x38] sm:$0xff]  ;;  %v37_v21 = vld [vmem:[%s2338_s0 + $0x8] sm:$0xff]  ;;  %v201_v22 = vld [vmem:[%s2336_s2 + $0x40] sm:$0xff] }
   0x6   :  { %1590 = vmatpush3.bf16.msra.mxu0 %v1587_v12  ;;  %1225 = vmatprep.mubr.msk.f32.mxu0 %vm55_vm1, %v36_v16  ;;  %v1963_v20 = vpack.c.bf16 %v200_v19, %v199_v18  ;;  %v202_v23 = vld [vmem:[%s2336_s2 + $0x48] sm:$0xff]  ;;  %v203_v25 = vld [vmem:[%s2336_s2 + $0x50] sm:$0xff]  ;;  %v204_v26 = vld [vmem:[%s2336_s2 + $0x58] sm:$0xff] }
   0x7   :  { %1592 = vmatprep.subr.bf16.mxu0 %v1591_v15  ;;  %v1978_v24 = vpack.c.bf16 %v202_v23, %v201_v22  ;;  %v1990_v27 = vpack.c.bf16 %v204_v26, %v203_v25  ;;  %v205_v28 = vld [vmem:[%s2336_s2 + $0x60] sm:$0xff]  ;;  %v206_v29 = vld [vmem:[%s2336_s2 + $0x68] sm:$0xff]  ;;  %v207_v31 = vld [vmem:[%s2336_s2 + $0x70] sm:$0xff] }
   0x8   :  { %1600 = vmatpush3.bf16.msra.mxu1 %v1927_v7  ;;  %v2002_v30 = vpack.c.bf16 %v206_v29, %v205_v28  ;;  %v208_v32 = vld [vmem:[%s2336_s2 + $0x78] sm:$0xff]  ;;  %v38_v34 = vld [vmem:[%s2338_s0 + $0x10] sm:$0xff]  ;;  %v40_v36 = vld [vmem:[%s2338_s0 + $0x20] sm:$0xff] }
   0x9   :  { %1601 = vmatprep.subr.bf16.mxu1 %v1856_v0  ;;  %v2014_v33 = vpack.c.bf16 %v208_v32, %v207_v31  ;;  %v39_v35 = vld [vmem:[%s2338_s0 + $0x18] sm:$0xff]  ;;  %v41_v37 = vld [vmem:[%s2338_s0 + $0x28] sm:$0xff]  ;;  %v42_v38 = vld [vmem:[%s2338_s0 + $0x30] sm:$0xff] }
   0xa   :  { %1594 = vmatpush3.bf16.msra.mxu0 %v1591_v15  ;;  %v43_v39 = vld [vmem:[%s2338_s0 + $0x38] sm:$0xff]  ;;  %v2077_v42 = vld [vmem:[%s2339_s3] ss:$0 sm:$0xff]  ;;  %v821_v18 = vld [vmem:[%s2341_s4 + $0x8] sm:$0xff] }
   0xb   :  { %1619 = vmatprep.subr.bf16.mxu0 %v1856_v0  ;;  %v822_v19 = vld [vmem:[%s2341_s4 + $0x10] sm:$0xff]  ;;  %v824_v23 = vld [vmem:[%s2341_s4 + $0x20] sm:$0xff] }
   0xc   :  { %1603 = vmatpush3.bf16.msra.mxu1 %v1952_v17  ;;  %v826_v26 = vld [vmem:[%s2341_s4 + $0x30] sm:$0xff]  ;;  %v828_v29 = vld [vmem:[%s2341_s4 + $0x40] sm:$0xff] }
   0xd   :  { %1604 = vmatprep.subr.bf16.mxu1 %v1856_v0  ;;  %1226 = vmatmul.mubr.msk.f32.vlgmr.msra.gmra.mrb[0].mxu0 %vm55_vm1, %v37_v21  ;;  %v823_v21 = vld [vmem:[%s2341_s4 + $0x18] sm:$0xff] }
   0xe   :  { %1621 = vmatpush3.bf16.msra.mxu0 %v1921_v5  ;;  %1228 = vmatprep.mubr.msk.f32.mxu0 %vm55_vm1, %v38_v34  ;;  %v1791_v22 = vpack.c.bf16 %v823_v21, %v822_v19 }
   0xf   :  { %1622 = vmatprep.subr.bf16.mxu0 %v1856_v0 }
  0x10   :  { %1606 = vmatpush3.bf16.msra.mxu1 %v1963_v20 }
  0x11   :  { %1607 = vmatprep.subr.bf16.mxu1 %v1856_v0  ;;  %1229 = vmatmul.mubr.msk.f32.gmra.mrb[2].mxu0 %vm55_vm1, %v39_v35 }
  0x12   :  { %1624 = vmatpush3.bf16.msra.mxu0 %v1927_v7  ;;  %1231 = vmatprep.mubr.msk.f32.mxu0 %vm55_vm1, %v40_v36 }
  0x13   :  { %1625 = vmatprep.subr.bf16.mxu0 %v1856_v0 }
  0x14   :  { %1609 = vmatpush3.bf16.msra.mxu1 %v1978_v24 }
  0x15   :  { %1610 = vmatprep.subr.bf16.mxu1 %v1856_v0  ;;  %1232 = vmatmul.mubr.msk.f32.gmra.mrb[4].mxu0 %vm55_vm1, %v41_v37  ;;  %v830_v37 = vld [vmem:[%s2341_s4 + $0x50] sm:$0xff] }
  0x16   :  { %1627 = vmatpush3.bf16.msra.mxu0 %v1952_v17  ;;  %1234 = vmatprep.mubr.msk.f32.mxu0 %vm55_vm1, %v42_v38  ;;  %v831_v38 = vld [vmem:[%s2341_s4 + $0x58] sm:$0xff] }
  0x17   :  { %1628 = vmatprep.subr.bf16.mxu0 %v1856_v0 }
  0x18   :  { %1612 = vmatpush3.bf16.msra.mxu1 %v1990_v27 }
  0x19   :  { %1613 = vmatprep.subr.bf16.mxu1 %v1856_v0  ;;  %1235 = vmatmul.mubr.msk.f32.gmra.mrb[6].mxu0 %vm55_vm1, %v43_v39  ;;  %v1803_v39 = vpack.c.bf16 %v831_v38, %v830_v37 }
  0x1a   :  { %1630 = vmatpush3.bf16.msra.mxu0 %v1963_v20  ;;  %1304 = vmatprep.mubr.msk.f32.mxu0 %vm1857_vm0, %v1858_v4 }
  0x1b   :  { %1631 = vmatprep.subr.bf16.mxu0 %v1856_v0 }
  0x1c   :  { %1615 = vmatpush3.bf16.msra.mxu1 %v2002_v30 }
  0x1d   :  { %1616 = vmatprep.subr.bf16.mxu1 %v1856_v0 }
  0x1e   :  { %1633 = vmatpush3.bf16.msra.mxu0 %v1978_v24 }
  0x1f   :  { %1634 = vmatprep.subr.bf16.mxu0 %v1856_v0 }
  0x20   :  { %1618 = vmatpush3.bf16.msra.mxu1 %v2014_v33 }
  0x21   :  { %1643 = vmatprep.subr.bf16.mxu1 %v1856_v0 }
  0x22   :  { %1636 = vmatpush3.bf16.msra.mxu0 %v1990_v27 }
  0x23   :  { %1270 = vmatmul.mubr.f32.vlgmr.msra.gmra.mrb[0].mxu1 %v1858_v4  ;;  %1637 = vmatprep.subr.bf16.mxu0 %v1856_v0 }
  0x24   :  { %1645 = vmatpush3.bf16.msra.mxu1 %v1921_v5  ;;  %1339 = vmatprep.mubr.msk.f32.mxu1 %vm1857_vm0, %v1858_v4 }
  0x25   :  { %1646 = vmatprep.subr.bf16.mxu1 %v1856_v0 }
  0x26   :  { %1639 = vmatpush3.bf16.msra.mxu0 %v2002_v30 }
  0x27   :  { %1640 = vmatprep.subr.bf16.mxu0 %v1856_v0 }
  0x28   :  { %1648 = vmatpush3.bf16.msra.mxu1 %v1927_v7 }
  0x29   :  { %1649 = vmatprep.subr.bf16.mxu1 %v1856_v0 }
  0x2a   :  { %1642 = vmatpush3.bf16.msra.mxu0 %v2014_v33 }
  0x2b   :  { %1667 = vmatprep.subr.bf16.mxu0 %v1856_v0 }
  0x2c   :  { %1651 = vmatpush3.bf16.msra.mxu1 %v1952_v17 }
  0x2d   :  { %1652 = vmatprep.subr.bf16.mxu1 %v1856_v0 }
  0x30   :  { %1654 = vmatpush3.bf16.msra.mxu1 %v1963_v20 }
  0x31   :  { %1655 = vmatprep.subr.bf16.mxu1 %v1856_v0 }
  0x34   :  { %1657 = vmatpush3.bf16.msra.mxu1 %v1978_v24 }
  0x35   :  { %1658 = vmatprep.subr.bf16.mxu1 %v1856_v0 }
  0x38   :  { %1660 = vmatpush3.bf16.msra.mxu1 %v1990_v27 }
  0x39   :  { %1661 = vmatprep.subr.bf16.mxu1 %v1856_v0 }
  0x3c   :  { %1663 = vmatpush3.bf16.msra.mxu1 %v2002_v30 }
  0x3d   :  { %1664 = vmatprep.subr.bf16.mxu1 %v1856_v0 }
  0x40   :  { %1666 = vmatpush3.bf16.msra.mxu1 %v2014_v33 }
  0x41   :  { %1691 = vmatprep.subr.bf16.mxu1 %v1856_v0 }
  0xe0   :  { %v1227_v40 = vpop.f32.mrb[0].mxu0 }
  0xe1   :  { %v146_v41 = vpop.f32.mrb[1].mxu0  ;;  %v152_v54 = vadd.f32 %v1227_v40, %v2077_v42  ;;  %v832_v40 = vld [vmem:[%s2341_s4 + $0x60] sm:$0xff] }
  0xe2   :  { %v147_v43 = vadd.f32 %v2077_v42, %v146_v41 }
  0xe4   :  { %v1230_v48 = vpop.f32.mrb[2].mxu0 }
  0xe5   :  { %v156_v49 = vpop.f32.mrb[3].mxu0  ;;  %v162_v1 = vadd.f32 %v1230_v48, %v2077_v42  ;;  %v916_v48 = vld [vmem:[%s2342_s6 + $0x10] sm:$0xff] }
  0xe6   :  { %v157_v59 = vadd.f32 %v2077_v42, %v156_v49 }
  0xe8   :  { %v2101_v50 = vpop.f32.mrb[4].mxu0 }
  0xe9   :  { %v2103_v51 = vpop.f32.mrb[5].mxu0 }
  0xea   :  { %v167_v9 = vadd.f32 %v2077_v42, %v2103_v51 }
  0xec   :  { %v2105_v52 = vpop.f32.mrb[6].mxu0 }
  0xed   :  { %v2107_v53 = vpop.f32.mrb[7].mxu0 }
  0xee   :  { %v177_v32 = vadd.f32 %v2077_v42, %v2107_v53  ;;  %v918_v53 = vld [vmem:[%s2342_s6 + $0x20] sm:$0xff] }
  0xf6   :  { %v277_v44 = vpop.f32.mrb[0].mxu1 }
  0xf7   :  { %v281_v45 = vadd.f32 %v277_v44, %v147_v43  ;;  %v1271_v46 = vpop.f32.mrb[1].mxu1  ;;  %v834_v43 = vld [vmem:[%s2341_s4 + $0x70] sm:$0xff]  ;;  %v835_v44 = vld [vmem:[%s2341_s4 + $0x78] sm:$0xff] }
  0xf8   :  { %v914_v46 = vld [vmem:[%s2342_s6] sm:$0xff] }
  0xf9   :  { %1838 = vtanh.f32 %v281_v45  ;;  %v1809_v45 = vpack.c.bf16 %v835_v44, %v834_v43 }
 0x103   :  { %v1839_v47 = vpop.eup %1838 }
 0x104   :  { %283 = vst [vmem:[%s2340_s8] sm:$0xff] %v1839_v47  ;;  %1305 = vmatmul.mubr.f32.vlgmr.msra.gmra.mrb[8].mxu0 %v1839_v47  ;;  %v915_v47 = vld [vmem:[%s2342_s6 + $0x8] sm:$0xff] }
 0x105   :  { %1669 = vmatpush3.bf16.msra.mxu0 %v1921_v5  ;;  %1374 = vmatprep.mubr.msk.f32.mxu0 %vm1857_vm0, %v1858_v4  ;;  %v1812_v49 = vpack.c.bf16 %v915_v47, %v914_v46 }
 0x106   :  { %1670 = vmatprep.subr.bf16.mxu0 %v1856_v0 }
 0x109   :  { %1672 = vmatpush3.bf16.msra.mxu0 %v1927_v7 }
 0x10a   :  { %1673 = vmatprep.subr.bf16.mxu0 %v1856_v0 }
 0x10d   :  { %1675 = vmatpush3.bf16.msra.mxu0 %v1952_v17 }
 0x10e   :  { %1676 = vmatprep.subr.bf16.mxu0 %v1856_v0 }
 0x111   :  { %1678 = vmatpush3.bf16.msra.mxu0 %v1963_v20 }
 0x112   :  { %1679 = vmatprep.subr.bf16.mxu0 %v1856_v0 }
 0x115   :  { %1681 = vmatpush3.bf16.msra.mxu0 %v1978_v24 }
 0x116   :  { %1682 = vmatprep.subr.bf16.mxu0 %v1856_v0 }
 0x119   :  { %1684 = vmatpush3.bf16.msra.mxu0 %v1990_v27 }
 0x11a   :  { %1685 = vmatprep.subr.bf16.mxu0 %v1856_v0 }
 0x11d   :  { %1687 = vmatpush3.bf16.msra.mxu0 %v2002_v30 }
 0x11e   :  { %1688 = vmatprep.subr.bf16.mxu0 %v1856_v0 }
 0x121   :  { %1690 = vmatpush3.bf16.msra.mxu0 %v2014_v33 }
 0x122   :  { %1715 = vmatprep.subr.bf16.mxu0 %v1856_v0 }
 0x1d7   :  { %v352_v55 = vpop.f32.mrb[8].mxu0 }
 0x1d8   :  { %v356_v56 = vadd.f32 %v352_v55, %v152_v54  ;;  %v1306_v57 = vpop.f32.mrb[9].mxu0  ;;  %v919_v54 = vld [vmem:[%s2342_s6 + $0x28] sm:$0xff] }
 0x1d9   :  { %v1818_v55 = vpack.c.bf16 %v919_v54, %v918_v53  ;;  %v921_v57 = vld [vmem:[%s2342_s6 + $0x38] sm:$0xff] }
 0x1da   :  { %1840 = vtanh.f32 %v356_v56  ;;  %v920_v56 = vld [vmem:[%s2342_s6 + $0x30] sm:$0xff] }
 0x1e4   :  { %v1841_v58 = vpop.eup %1840 }
 0x1e5   :  { %1026 = vst [vmem:[%s2340_s8 + $0x8] sm:$0xff] %v1841_v58  ;;  %1340 = vmatmul.mubr.f32.vlgmr.msra.gmra.mrb[2].mxu1 %v1841_v58  ;;  %v1821_v58 = vpack.c.bf16 %v921_v57, %v920_v56 }
 0x1e6   :  { %1693 = vmatpush3.bf16.msra.mxu1 %v1921_v5  ;;  %1409 = vmatprep.mubr.msk.f32.mxu1 %vm1857_vm0, %v1858_v4 }
 0x1e7   :  { %1694 = vmatprep.subr.bf16.mxu1 %v1856_v0 }
 0x1ea   :  { %1696 = vmatpush3.bf16.msra.mxu1 %v1927_v7 }
 0x1eb   :  { %1697 = vmatprep.subr.bf16.mxu1 %v1856_v0 }
 0x1ee   :  { %1699 = vmatpush3.bf16.msra.mxu1 %v1952_v17 }
 0x1ef   :  { %1700 = vmatprep.subr.bf16.mxu1 %v1856_v0 }
 0x1f2   :  { %1702 = vmatpush3.bf16.msra.mxu1 %v1963_v20 }
 0x1f3   :  { %1703 = vmatprep.subr.bf16.mxu1 %v1856_v0 }
 0x1f6   :  { %1705 = vmatpush3.bf16.msra.mxu1 %v1978_v24 }
 0x1f7   :  { %1706 = vmatprep.subr.bf16.mxu1 %v1856_v0 }
 0x1fa   :  { %1708 = vmatpush3.bf16.msra.mxu1 %v1990_v27 }
 0x1fb   :  { %1709 = vmatprep.subr.bf16.mxu1 %v1856_v0 }
 0x1fe   :  { %1711 = vmatpush3.bf16.msra.mxu1 %v2002_v30 }
 0x1ff   :  { %1712 = vmatprep.subr.bf16.mxu1 %v1856_v0 }
 0x202   :  { %1714 = vmatpush3.bf16.msra.mxu1 %v2014_v33 }
 0x203   :  { %1739 = vmatprep.subr.bf16.mxu1 %v1856_v0 }
 0x2b8   :  { %v428_v60 = vpop.f32.mrb[2].mxu1 }
 0x2b9   :  { %v432_v61 = vadd.f32 %v428_v60, %v157_v59  ;;  %v1341_v62 = vpop.f32.mrb[3].mxu1  ;;  %v922_v59 = vld [vmem:[%s2342_s6 + $0x40] sm:$0xff]  ;;  %v923_v60 = vld [vmem:[%s2342_s6 + $0x48] sm:$0xff] }
 0x2ba   :  { %v924_v62 = vld [vmem:[%s2342_s6 + $0x50] sm:$0xff] }
 0x2bb   :  { %1842 = vtanh.f32 %v432_v61  ;;  %v1824_v61 = vpack.c.bf16 %v923_v60, %v922_v59 }
 0x2c5   :  { %v1843_v63 = vpop.eup %1842 }
 0x2c6   :  { %1027 = vst [vmem:[%s2340_s8 + $0x10] sm:$0xff] %v1843_v63  ;;  %1375 = vmatmul.mubr.f32.vlgmr.msra.gmra.mrb[10].mxu0 %v1843_v63  ;;  %v925_v63 = vld [vmem:[%s2342_s6 + $0x58] sm:$0xff] }
 0x2c7   :  { %1717 = vmatpush3.bf16.msra.mxu0 %v1921_v5  ;;  %1444 = vmatprep.mubr.msk.f32.mxu0 %vm1857_vm0, %v1858_v4 }
 0x2c8   :  { %1718 = vmatprep.subr.bf16.mxu0 %v1856_v0 }
 0x2cb   :  { %1720 = vmatpush3.bf16.msra.mxu0 %v1927_v7 }
 0x2cc   :  { %1721 = vmatprep.subr.bf16.mxu0 %v1856_v0 }
 0x2cf   :  { %1723 = vmatpush3.bf16.msra.mxu0 %v1952_v17 }
 0x2d0   :  { %1724 = vmatprep.subr.bf16.mxu0 %v1856_v0 }
 0x2d3   :  { %1726 = vmatpush3.bf16.msra.mxu0 %v1963_v20 }
 0x2d4   :  { %1727 = vmatprep.subr.bf16.mxu0 %v1856_v0 }
 0x2d7   :  { %1729 = vmatpush3.bf16.msra.mxu0 %v1978_v24 }
 0x2d8   :  { %1730 = vmatprep.subr.bf16.mxu0 %v1856_v0 }
 0x2db   :  { %1732 = vmatpush3.bf16.msra.mxu0 %v1990_v27 }
 0x2dc   :  { %1733 = vmatprep.subr.bf16.mxu0 %v1856_v0 }
 0x2df   :  { %1735 = vmatpush3.bf16.msra.mxu0 %v2002_v30 }
 0x2e0   :  { %1736 = vmatprep.subr.bf16.mxu0 %v1856_v0 }
 0x2e3   :  { %1738 = vmatpush3.bf16.msra.mxu0 %v2014_v33 }
 0x2e4   :  { %1763 = vmatprep.subr.bf16.mxu0 %v1856_v0 }
 0x399   :  { %v504_v2 = vpop.f32.mrb[10].mxu0 }
 0x39a   :  { %v508_v3 = vadd.f32 %v504_v2, %v162_v1  ;;  %v1376_v6 = vpop.f32.mrb[11].mxu0  ;;  %v1827_v1 = vpack.c.bf16 %v925_v63, %v924_v62  ;;  %v926_v2 = vld [vmem:[%s2342_s6 + $0x60] sm:$0xff] }
 0x39c   :  { %1844 = vtanh.f32 %v508_v3  ;;  %v927_v3 = vld [vmem:[%s2342_s6 + $0x68] sm:$0xff] }
 0x39d   :  { %v1830_v6 = vpack.c.bf16 %v927_v3, %v926_v2 }
 0x3a6   :  { %v1845_v8 = vpop.eup %1844 }
 0x3a7   :  { %1028 = vst [vmem:[%s2340_s8 + $0x18] sm:$0xff] %v1845_v8  ;;  %1410 = vmatmul.mubr.f32.vlgmr.msra.gmra.mrb[4].mxu1 %v1845_v8  ;;  %v182_v8 = vadd.f32 %v2105_v52, %v2077_v42 }
 0x3a8   :  { %1741 = vmatpush3.bf16.msra.mxu1 %v1921_v5  ;;  %1479 = vmatprep.mubr.msk.f32.mxu1 %vm1857_vm0, %v1858_v4 }
 0x3a9   :  { %1742 = vmatprep.subr.bf16.mxu1 %v1856_v0 }
 0x3ac   :  { %1744 = vmatpush3.bf16.msra.mxu1 %v1927_v7 }
 0x3ad   :  { %1745 = vmatprep.subr.bf16.mxu1 %v1856_v0 }
 0x3b0   :  { %1747 = vmatpush3.bf16.msra.mxu1 %v1952_v17 }
 0x3b1   :  { %1748 = vmatprep.subr.bf16.mxu1 %v1856_v0 }
 0x3b4   :  { %1750 = vmatpush3.bf16.msra.mxu1 %v1963_v20 }
 0x3b5   :  { %1751 = vmatprep.subr.bf16.mxu1 %v1856_v0 }
 0x3b8   :  { %1753 = vmatpush3.bf16.msra.mxu1 %v1978_v24 }
 0x3b9   :  { %1754 = vmatprep.subr.bf16.mxu1 %v1856_v0 }
 0x3bc   :  { %1756 = vmatpush3.bf16.msra.mxu1 %v1990_v27 }
 0x3bd   :  { %1757 = vmatprep.subr.bf16.mxu1 %v1856_v0 }
 0x3c0   :  { %1759 = vmatpush3.bf16.msra.mxu1 %v2002_v30 }
 0x3c1   :  { %1760 = vmatprep.subr.bf16.mxu1 %v1856_v0 }
 0x3c4   :  { %1762 = vmatpush3.bf16.msra.mxu1 %v2014_v33 }
 0x3c5   :  { %1787 = vmatprep.subr.bf16.mxu1 %v1856_v0 }
 0x47a   :  { %v580_v10 = vpop.f32.mrb[4].mxu1 }
 0x47b   :  { %v584_v11 = vadd.f32 %v580_v10, %v167_v9  ;;  %v1411_v12 = vpop.f32.mrb[5].mxu1 }
 0x47d   :  { %1846 = vtanh.f32 %v584_v11 }
 0x487   :  { %v1847_v13 = vpop.eup %1846 }
 0x488   :  { %1029 = vst [vmem:[%s2340_s8 + $0x20] sm:$0xff] %v1847_v13  ;;  %1445 = vmatmul.mubr.f32.vlgmr.msra.gmra.mrb[12].mxu0 %v1847_v13  ;;  %v928_v13 = vld [vmem:[%s2342_s6 + $0x70] sm:$0xff] }
 0x489   :  { %1765 = vmatpush3.bf16.msra.mxu0 %v1921_v5  ;;  %1514 = vmatprep.mubr.msk.f32.mxu0 %vm1857_vm0, %v1858_v4  ;;  %v172_v5 = vadd.f32 %v2101_v50, %v2077_v42  ;;  %v917_v50 = vld [vmem:[%s2342_s6 + $0x18] sm:$0xff]  ;;  %v1033_v42 = vld [vmem:[%s2343_s5] ss:$0 sm:$0xff] }
 0x48a   :  { %1766 = vmatprep.subr.bf16.mxu0 %v1856_v0  ;;  %v1815_v51 = vpack.c.bf16 %v917_v50, %v916_v48 }
 0x48d   :  { %1768 = vmatpush3.bf16.msra.mxu0 %v1927_v7 }
 0x48e   :  { %1769 = vmatprep.subr.bf16.mxu0 %v1856_v0 }
 0x491   :  { %1771 = vmatpush3.bf16.msra.mxu0 %v1952_v17  ;;  %v820_v17 = vld [vmem:[%s2341_s4] sm:$0xff] }
 0x492   :  { %1772 = vmatprep.subr.bf16.mxu0 %v1856_v0 }
 0x495   :  { %1774 = vmatpush3.bf16.msra.mxu0 %v1963_v20  ;;  %v1788_v20 = vpack.c.bf16 %v821_v18, %v820_v17 }
 0x496   :  { %1775 = vmatprep.subr.bf16.mxu0 %v1856_v0 }
 0x499   :  { %1777 = vmatpush3.bf16.msra.mxu0 %v1978_v24  ;;  %v825_v24 = vld [vmem:[%s2341_s4 + $0x28] sm:$0xff] }
 0x49a   :  { %1778 = vmatprep.subr.bf16.mxu0 %v1856_v0  ;;  %v1794_v25 = vpack.c.bf16 %v825_v24, %v824_v23 }
 0x49d   :  { %1780 = vmatpush3.bf16.msra.mxu0 %v1990_v27  ;;  %v827_v27 = vld [vmem:[%s2341_s4 + $0x38] sm:$0xff] }
 0x49e   :  { %1781 = vmatprep.subr.bf16.mxu0 %v1856_v0  ;;  %v1797_v28 = vpack.c.bf16 %v827_v27, %v826_v26 }
 0x4a1   :  { %1783 = vmatpush3.bf16.msra.mxu0 %v2002_v30  ;;  %v829_v30 = vld [vmem:[%s2341_s4 + $0x48] sm:$0xff] }
 0x4a2   :  { %1784 = vmatprep.subr.bf16.mxu0 %v1856_v0  ;;  %v1800_v31 = vpack.c.bf16 %v829_v30, %v828_v29 }
 0x4a5   :  { %1786 = vmatpush3.bf16.msra.mxu0 %v2014_v33 }
 0x4a6   :  { %1811 = vmatprep.subr.bf16.mxu0 %v1856_v0 }
 0x55b   :  { %v656_v7 = vpop.f32.mrb[12].mxu0 }
 0x55c   :  { %v660_v14 = vadd.f32 %v656_v7, %v172_v5  ;;  %v1446_v15 = vpop.f32.mrb[13].mxu0 }
 0x55e   :  { %1848 = vtanh.f32 %v660_v14 }
 0x568   :  { %v1849_v16 = vpop.eup %1848 }
 0x569   :  { %1030 = vst [vmem:[%s2340_s8 + $0x28] sm:$0xff] %v1849_v16  ;;  %1480 = vmatmul.mubr.f32.vlgmr.msra.gmra.mrb[6].mxu1 %v1849_v16  ;;  %v1034_v16 = vld [vmem:[%s2344_s7] ss:$0 sm:$0xff] }
 0x56a   :  { %1549 = vmatprep.mubr.msk.f32.mxu1 %vm1857_vm0, %v1858_v4  ;;  %1789 = vmatpush3.bf16.msra.mxu1 %v1788_v20 }
 0x56b   :  { %1790 = vmatprep.subr.bf16.mxu1 %v1856_v0 }
 0x56e   :  { %1792 = vmatpush3.bf16.msra.mxu1 %v1791_v22 }
 0x56f   :  { %1793 = vmatprep.subr.bf16.mxu1 %v1856_v0 }
 0x572   :  { %1795 = vmatpush3.bf16.msra.mxu1 %v1794_v25 }
 0x573   :  { %1796 = vmatprep.subr.bf16.mxu1 %v1856_v0 }
 0x576   :  { %1798 = vmatpush3.bf16.msra.mxu1 %v1797_v28 }
 0x577   :  { %1799 = vmatprep.subr.bf16.mxu1 %v1856_v0 }
 0x57a   :  { %1801 = vmatpush3.bf16.msra.mxu1 %v1800_v31 }
 0x57b   :  { %1802 = vmatprep.subr.bf16.mxu1 %v1856_v0 }
 0x57e   :  { %1804 = vmatpush3.bf16.msra.mxu1 %v1803_v39 }
 0x57f   :  { %1805 = vmatprep.subr.bf16.mxu1 %v1856_v0 }
 0x63c   :  { %v732_v33 = vpop.f32.mrb[6].mxu1 }
 0x63d   :  { %v736_v34 = vadd.f32 %v732_v33, %v177_v32  ;;  %v1481_v35 = vpop.f32.mrb[7].mxu1 }
 0x63f   :  { %1850 = vtanh.f32 %v736_v34 }
 0x649   :  { %v1851_v36 = vpop.eup %1850 }
 0x64a   :  { %1031 = vst [vmem:[%s2340_s8 + $0x30] sm:$0xff] %v1851_v36  ;;  %1515 = vmatmul.mubr.f32.vlgmr.msra.gmra.mrb[14].mxu0 %v1851_v36 }
 0x64b   :  { %1584 = vmatprep.mubr.msk.f32.mxu0 %vm1857_vm0, %v1858_v4  ;;  %v833_v4 = vld [vmem:[%s2341_s4 + $0x68] sm:$0xff]  ;;  %1813 = vmatpush3.bf16.msra.mxu0 %v1812_v49 }
 0x64c   :  { %v1806_v41 = vpack.c.bf16 %v833_v4, %v832_v40  ;;  %1814 = vmatprep.subr.bf16.mxu0 %v1856_v0 }
 0x64e   :  { %1807 = vmatpush3.bf16.msra.mxu1 %v1806_v41 }
 0x64f   :  { %1808 = vmatprep.subr.bf16.mxu1 %v1856_v0  ;;  %1816 = vmatpush3.bf16.msra.mxu0 %v1815_v51 }
 0x650   :  { %1817 = vmatprep.subr.bf16.mxu0 %v1856_v0 }
 0x652   :  { %1810 = vmatpush3.bf16.msra.mxu1 %v1809_v45 }
 0x653   :  { %1819 = vmatpush3.bf16.msra.mxu0 %v1818_v55 }
 0x654   :  { %1820 = vmatprep.subr.bf16.mxu0 %v1856_v0 }
 0x657   :  { %1822 = vmatpush3.bf16.msra.mxu0 %v1821_v58 }
 0x658   :  { %1823 = vmatprep.subr.bf16.mxu0 %v1856_v0 }
 0x65b   :  { %1825 = vmatpush3.bf16.msra.mxu0 %v1824_v61 }
 0x65c   :  { %1826 = vmatprep.subr.bf16.mxu0 %v1856_v0 }
 0x65f   :  { %1828 = vmatpush3.bf16.msra.mxu0 %v1827_v1 }
 0x660   :  { %1829 = vmatprep.subr.bf16.mxu0 %v1856_v0 }
 0x663   :  { %1831 = vmatpush3.bf16.msra.mxu0 %v1830_v6 }
 0x664   :  { %1832 = vmatprep.subr.bf16.mxu0 %v1856_v0  ;;  %v929_v0 = vld [vmem:[%s2342_s6 + $0x78] sm:$0xff] }
 0x665   :  { %v1833_v5 = vpack.c.bf16 %v929_v0, %v928_v13 }
 0x667   :  { %1834 = vmatpush3.bf16.msra.mxu0 %v1833_v5 }
 0x71d   :  { %v808_v9 = vpop.f32.mrb[14].mxu0 }
 0x71e   :  { %v812_v10 = vadd.f32 %v808_v9, %v182_v8  ;;  %v1516_v11 = vpop.f32.mrb[15].mxu0 }
 0x720   :  { %1852 = vtanh.f32 %v812_v10 }
 0x72a   :  { %v1853_v12 = vpop.eup %1852 }
 0x72b   :  { %1032 = vst [vmem:[%s2340_s8 + $0x38] sm:$0xff] %v1853_v12  ;;  %1550 = vmatmul.mubr.f32.vlgmr.msra.gmra.mrb[8].mxu1 %v1853_v12 }
 0x7fe   :  { %v909_v52 = vpop.f32.mrb[8].mxu1 }
 0x7ff   :  { %v910_v7 = vadd.f32 %v1033_v42, %v909_v52  ;;  %v1551_v14 = vpop.f32.mrb[9].mxu1 }
 0x801   :  { %v913_v15 = vmax.f32 %v910_v7, 0.0 }
 0x803   :  { %1585 = vmatmul.mubr.f32.vlgmr.msra.gmra.mrb[16].mxu0 %v913_v15 }
 0x8d6   :  { %v1003_v17 = vpop.f32.mrb[16].mxu0 }
 0x8d7   :  { %v1004_v18 = vadd.f32 %v1034_v16, %v1003_v17  ;;  %v1586_v19 = vpop.f32.mrb[17].mxu0 }
 0x8d9   :  { %1854 = vtanh.f32 %v1004_v18 }
 0x8e3   :  { %v1855_v20 = vpop.eup %1854 }
 0x8e4   :  { %1008 = vst [vmem:[%s2345_s9] sm:$0xff] %v1855_v20 }

</bundles_post_ra>
